<compile_context>
chip_gen: v7x
topology: tpu7x:2x2x1
jax: 0.10.0
libtpu: 0.0.40
codegen_flags: <defaults>
</compile_context>

<pallas_src>
import functools

import jax
import jax.numpy as jnp
from jax.experimental import pallas as pl
from jax.experimental.pallas import tpu as pltpu

_LANE = 128
_SUBLANE = 8


def _round_up(n, m):
    return ((n + m - 1) // m) * m


def qnet_kernel(x_ref, w1_ref, b1_ref, w2_ref, b2_ref, o_ref):
    """Fused Linear -> ReLU -> Linear on one batch tile."""
    # layer1 on the MXU, f32 accumulation.
    h = jnp.dot(x_ref[...], w1_ref[...], preferred_element_type=jnp.float32)
    # bias add + ReLU in f32 on the VPU (padded hidden lanes stay exactly 0).
    h = jnp.maximum(h + b1_ref[...], 0.0)
    # layer2: cast h to the (possibly bf16) weight dtype only at the MXU edge.
    out = jnp.dot(h.astype(w2_ref.dtype), w2_ref[...],
                  preferred_element_type=jnp.float32)
    o_ref[...] = (out + b2_ref[...]).astype(o_ref.dtype)


@functools.partial(jax.jit, static_argnames=("block_batch", "compute_dtype"))
def qnet_forward(x, w1, b1, w2, b2, *, block_batch=2048, compute_dtype=None):
    """Fused Linear -> ReLU -> Linear forward.

    x:  [B, in_f]
    w1: [in_f, hid]   (PyTorch layer1.weight.T)
    b1: [hid]
    w2: [hid, out]    (PyTorch layer2.weight.T)
    b2: [out]
    Returns [B, out] in x.dtype.
    """
    B, in_f = x.shape
    hid = w1.shape[1]
    out_f = w2.shape[1]
    out_dtype = x.dtype
    if compute_dtype is None:
        # Stream x in its own dtype: forcing a cast would add a full extra
        # HBM read+write of x in the wrapper and negate any DMA saving.
        compute_dtype = x.dtype
    f32 = jnp.float32

    # ---- feature-dim padding ------------------------------------------------
    # hidden: pad to a full 128-lane width (weights are resident so the
    # one-time DMA cost is negligible; the h intermediate never hits HBM).
    hid_p = _round_up(hid, _LANE)
    # output: do NOT pad small out_f -- padded f32 writeback would dominate
    # HBM traffic (16x inflation for out_f=8). Lane-pad only when out_f > 128.
    out_p = out_f if out_f <= _LANE else _round_up(out_f, _LANE)
    # input (K of layer 1): pad only when large and lane-misaligned (padding
    # tiny in_f would multiply x HBM traffic; a full-dim block is legal).
    in_f_p = _round_up(in_f, _LANE) if (in_f > _LANE and in_f % _LANE) else in_f

    # ---- batch tiling ---------------------------------------------------------
    desired = max(min(block_batch, B), 1)
    tb_align = 256 if desired >= 256 else _SUBLANE   # 256-wide MXU M tiles (v6e/v7x)
    tb = _round_up(desired, tb_align)
    tb = min(tb, _round_up(B, _SUBLANE))             # never (much) exceed the batch
    # Keep >= 2 grid steps when the batch allows it so the "parallel" batch
    # axis can actually be sharded across v7x's two TensorCores.
    if B >= 2 * tb_align and pl.cdiv(B, tb) < 2:
        tb = _round_up(pl.cdiv(B, 2), tb_align)
    grid = (pl.cdiv(B, tb),)

    # ---- wrapper-side prep ----------------------------------------------------
    # x: no batch padding / no copy in the common path. Casting or K-padding
    # (rare) each cost one extra pass over x; documented trade-off.
    x_s = x if x.dtype == compute_dtype else x.astype(compute_dtype)
    if in_f_p != in_f:
        x_s = jnp.pad(x_s, ((0, 0), (0, in_f_p - in_f)))

    # Weights / biases: static parameters -> padding & casting is cheap.
    # Biases stay f32 so bias-add / ReLU run in f32 after f32 MXU accumulation
    # (v5e VPU/EUP have no bf16).
    w1_p = jnp.pad(w1.astype(compute_dtype),
                   ((0, in_f_p - in_f), (0, hid_p - hid)))
    w2_p = jnp.pad(w2.astype(compute_dtype),
                   ((0, hid_p - hid), (0, out_p - out_f)))
    b1_p = jnp.pad(b1.astype(f32).reshape(1, -1), ((0, 0), (0, hid_p - hid)))
    b2_p = jnp.pad(b2.astype(f32).reshape(1, -1), ((0, 0), (0, out_p - out_f)))

    # ---- explicit VMEM budget (v5e scoped default is only 16 MiB) -------------
    c_item = jnp.dtype(compute_dtype).itemsize
    o_item = jnp.dtype(out_dtype).itemsize
    w_bytes = (in_f_p * hid_p + hid_p * out_p) * c_item + (hid_p + out_p) * 4
    stream_bytes = 2 * tb * in_f_p * c_item + 2 * tb * out_p * o_item
    scratch_bytes = tb * hid_p * 4 + tb * out_p * 4      # f32 intermediates
    needed = w_bytes + stream_bytes + scratch_bytes
    vmem_limit = int(min(max(2 * needed, 32 * 1024 * 1024), 56 * 1024 * 1024))

    resident = dict(pipeline_mode=pl.Buffered(1))   # fetched once, single-buffered

    out_padded = pl.pallas_call(
        qnet_kernel,
        out_shape=jax.ShapeDtypeStruct((B, out_p), out_dtype),
        grid=grid,
        in_specs=[
            # x streams over the batch grid axis (double-buffered by Pallas,
            # ragged final block masked by Pallas boundary handling).
            pl.BlockSpec((tb, in_f_p), lambda i: (i, 0)),
            # Weights & biases: constant index map + single buffer -> resident.
            pl.BlockSpec((in_f_p, hid_p), lambda i: (0, 0), **resident),
            pl.BlockSpec((1, hid_p), lambda i: (0, 0), **resident),
            pl.BlockSpec((hid_p, out_p), lambda i: (0, 0), **resident),
            pl.BlockSpec((1, out_p), lambda i: (0, 0), **resident),
        ],
        out_specs=pl.BlockSpec((tb, out_p), lambda i: (i, 0)),
        compiler_params=pltpu.CompilerParams(
            dimension_semantics=("parallel",),
            vmem_limit_bytes=vmem_limit),
    )(x_s, w1_p, b1_p, w2_p, b2_p)

    return out_padded if out_p == out_f else out_padded[:, :out_f]


def reference_forward(x, w1, b1, w2, b2):
    h = jnp.maximum(x @ w1 + b1.reshape(1, -1), 0.0)
    return h @ w2 + b2.reshape(1, -1)


if __name__ == "__main__":
    # Shapes implied by Q_net(in_features, hidden_features, out_features).
    batch = 8
    in_features = 16
    hidden_features = 32
    out_features = 8

    key = jax.random.PRNGKey(0)
    kx, k1, kb1, k2, kb2, kx2, kx3 = jax.random.split(key, 7)

    x = jax.random.normal(kx, (batch, in_features), dtype=jnp.float32)

    # Deterministic synthetic parameter init (PyTorch-Linear-like uniform scale).
    bound1 = 1.0 / (in_features ** 0.5)
    w1 = jax.random.uniform(k1, (in_features, hidden_features),
                            minval=-bound1, maxval=bound1, dtype=jnp.float32)
    b1 = jax.random.uniform(kb1, (hidden_features,),
                            minval=-bound1, maxval=bound1, dtype=jnp.float32)

    bound2 = 1.0 / (hidden_features ** 0.5)
    w2 = jax.random.uniform(k2, (hidden_features, out_features),
                            minval=-bound2, maxval=bound2, dtype=jnp.float32)
    b2 = jax.random.uniform(kb2, (out_features,),
                            minval=-bound2, maxval=bound2, dtype=jnp.float32)

    # 1) Tiny batch, f32 path (single grid step).
    ref = reference_forward(x, w1, b1, w2, b2)
    out = jax.block_until_ready(qnet_forward(x, w1, b1, w2, b2))
    assert out.shape == (batch, out_features)
    assert jnp.allclose(out, ref, atol=1e-4, rtol=1e-4)

    # 2) Non-aligned batch exercising a multi-step grid with a ragged final
    #    block (300 rows -> 2 tiles of 256, last one masked) + resident weights.
    x_big = jax.random.normal(kx2, (300, in_features), dtype=jnp.float32)
    ref_big = reference_forward(x_big, w1, b1, w2, b2)
    out_big = jax.block_until_ready(
        qnet_forward(x_big, w1, b1, w2, b2, block_batch=256))
    assert out_big.shape == (300, out_features)
    assert jnp.allclose(out_big, ref_big, atol=1e-4, rtol=1e-4)

    # 3) Larger batch with default block_batch: exercises the ">= 2 grid
    #    steps" clamp (1000 rows -> 2 tiles of 512, second one ragged).
    x_huge = jax.random.normal(kx3, (1000, in_features), dtype=jnp.float32)
    ref_huge = reference_forward(x_huge, w1, b1, w2, b2)
    out_huge = jax.block_until_ready(qnet_forward(x_huge, w1, b1, w2, b2))
    assert out_huge.shape == (1000, out_features)
    assert jnp.allclose(out_huge, ref_huge, atol=1e-4, rtol=1e-4)

    # 4) bf16 streaming path: x is ALREADY bf16 (no wrapper-side cast copy);
    #    error grows with in_f, hence the looser tolerance.
    x_bf16 = x_big.astype(jnp.bfloat16)
    out_bf16 = jax.block_until_ready(
        qnet_forward(x_bf16, w1, b1, w2, b2, block_batch=256))
    assert out_bf16.shape == (300, out_features)
    assert out_bf16.dtype == jnp.bfloat16
    assert jnp.allclose(out_bf16.astype(jnp.float32), ref_big,
                        atol=1e-1, rtol=1e-1)

    print("KERNEL_OK")
</pallas_src>

<mosaic_0001>
module attributes {stable_mosaic.version = 11 : i64} {
  func.func @qnet_kernel(%arg0: i32, %arg1: memref<8x16xf32, #tpu.memory_space<vmem>>, %arg2: memref<16x128xf32, #tpu.memory_space<vmem>>, %arg3: memref<1x128xf32, #tpu.memory_space<vmem>>, %arg4: memref<128x8xf32, #tpu.memory_space<vmem>>, %arg5: memref<1x8xf32, #tpu.memory_space<vmem>>, %arg6: memref<8x8xf32, #tpu.memory_space<vmem>>) attributes {dimension_semantics = [#tpu.dimension_semantics<parallel>], iteration_bounds = array<i64: 1>, scalar_prefetch = 0 : i64, scratch_operands = 0 : i64, tpu.core_type = #tpu.core_type<tc>, window_params = [{transform_indices = @transform_0, window_bounds = array<i64: 8, 16>}, {pipeline_mode = #tpu.pipeline_mode<synchronous>, transform_indices = @transform_1, window_bounds = array<i64: 16, 128>}, {pipeline_mode = #tpu.pipeline_mode<synchronous>, transform_indices = @transform_2, window_bounds = array<i64: 1, 128>}, {pipeline_mode = #tpu.pipeline_mode<synchronous>, transform_indices = @transform_3, window_bounds = array<i64: 128, 8>}, {pipeline_mode = #tpu.pipeline_mode<synchronous>, transform_indices = @transform_4, window_bounds = array<i64: 1, 8>}, {transform_indices = @transform_5, window_bounds = array<i64: 8, 8>}]} {
    %c0 = arith.constant 0 : index
    %c0_0 = arith.constant 0 : index
    %0 = vector.load %arg1[%c0, %c0_0] : memref<8x16xf32, #tpu.memory_space<vmem>>, vector<8x16xf32>
    %c0_1 = arith.constant 0 : index
    %c0_2 = arith.constant 0 : index
    %1 = vector.load %arg2[%c0_1, %c0_2] : memref<16x128xf32, #tpu.memory_space<vmem>>, vector<16x128xf32>
    %cst = arith.constant dense<0.000000e+00> : vector<8x128xf32>
    %2 = tpu.matmul %0, %1, %cst {dimension_numbers = #tpu.dot_dimension_numbers<[1], [0], [0], [1], [0, 0, 1, 1], [], []>} : vector<8x16xf32>, vector<16x128xf32>, vector<8x128xf32> -> vector<8x128xf32>
    %c0_3 = arith.constant 0 : index
    %c0_4 = arith.constant 0 : index
    %3 = vector.load %arg3[%c0_3, %c0_4] : memref<1x128xf32, #tpu.memory_space<vmem>>, vector<1x128xf32>
    %4 = vector.broadcast %3 : vector<1x128xf32> to vector<8x128xf32>
    %5 = arith.addf %2, %4 : vector<8x128xf32>
    %cst_5 = arith.constant 0.000000e+00 : f32
    %6 = vector.broadcast %cst_5 : f32 to vector<8x128xf32>
    %7 = arith.maximumf %5, %6 : vector<8x128xf32>
    %c0_6 = arith.constant 0 : index
    %c0_7 = arith.constant 0 : index
    %8 = vector.load %arg4[%c0_6, %c0_7] : memref<128x8xf32, #tpu.memory_space<vmem>>, vector<128x8xf32>
    %cst_8 = arith.constant dense<0.000000e+00> : vector<8x8xf32>
    %9 = tpu.matmul %7, %8, %cst_8 {dimension_numbers = #tpu.dot_dimension_numbers<[1], [0], [0], [1], [0, 0, 1, 1], [], []>} : vector<8x128xf32>, vector<128x8xf32>, vector<8x8xf32> -> vector<8x8xf32>
    %c0_9 = arith.constant 0 : index
    %c0_10 = arith.constant 0 : index
    %10 = vector.load %arg5[%c0_9, %c0_10] : memref<1x8xf32, #tpu.memory_space<vmem>>, vector<1x8xf32>
    %11 = vector.broadcast %10 : vector<1x8xf32> to vector<8x8xf32>
    %12 = arith.addf %9, %11 : vector<8x8xf32>
    %c0_11 = arith.constant 0 : index
    %c0_12 = arith.constant 0 : index
    %13 = vector.load %arg6[%c0_11, %c0_12] : memref<8x8xf32, #tpu.memory_space<vmem>>, vector<8x8xf32>
    tpu.vector_store %arg6[%c0_11, %c0_12], %12 {strides = array<i32>} : memref<8x8xf32, #tpu.memory_space<vmem>>, vector<8x8xf32>,
    return
  }
  func.func @transform_0(%arg0: i32) -> (i32, i32) {
    %c0_i32 = arith.constant 0 : i32
    %c0_i32_0 = arith.constant 0 : i32
    return %arg0, %c0_i32 : i32, i32
  }
  func.func @transform_1(%arg0: i32) -> (i32, i32) {
    %c0_i32 = arith.constant 0 : i32
    %c0_i32_0 = arith.constant 0 : i32
    %c0_i32_1 = arith.constant 0 : i32
    return %c0_i32, %c0_i32_0 : i32, i32
  }
  func.func @transform_2(%arg0: i32) -> (i32, i32) {
    %c0_i32 = arith.constant 0 : i32
    %c0_i32_0 = arith.constant 0 : i32
    %c0_i32_1 = arith.constant 0 : i32
    return %c0_i32, %c0_i32_0 : i32, i32
  }
  func.func @transform_3(%arg0: i32) -> (i32, i32) {
    %c0_i32 = arith.constant 0 : i32
    %c0_i32_0 = arith.constant 0 : i32
    %c0_i32_1 = arith.constant 0 : i32
    return %c0_i32, %c0_i32_0 : i32, i32
  }
  func.func @transform_4(%arg0: i32) -> (i32, i32) {
    %c0_i32 = arith.constant 0 : i32
    %c0_i32_0 = arith.constant 0 : i32
    %c0_i32_1 = arith.constant 0 : i32
    return %c0_i32, %c0_i32_0 : i32, i32
  }
  func.func @transform_5(%arg0: i32) -> (i32, i32) {
    %c0_i32 = arith.constant 0 : i32
    %c0_i32_0 = arith.constant 0 : i32
    return %arg0, %c0_i32 : i32, i32
  }
}

</mosaic_0001>

<bundles_post_ra>
// kernel: qnet_forward.1
= control target key start
LH: loop header
LB: loop body
LE: loop exit
PB: predicated region body
PF: predicated region fallthrough
CT: control target
= control target key end

     0   :  { %v335_v2 = vmov 0.0|0.0   ;;  %vm336_vm0 = vmmov 0   ;;  %v337_v4 = vmov 0.0   ;;  %vm31_vm1 = vcmask 130048   ;;  %s444_s0 = inlined_call_operand.vmem [shape: f32[8,16], index: 0, kind: input, shape index: {}]   ;;  %s445_s1 = inlined_call_operand.vmem [shape: f32[16,128], index: 1, kind: input, shape index: {}]   ;;  %s446_s2 = inlined_call_operand.vmem [shape: f32[1,128], index: 2, kind: input, shape index: {}]   ;;  %s447_s3 = inlined_call_operand.vmem [shape: f32[128,8], index: 3, kind: input, shape index: {}]   ;;  %s448_s4 = inlined_call_operand.vmem [shape: f32[1,8], index: 4, kind: input, shape index: {}]   ;;  %s449_s5 = inlined_call_operand.hbm [shape: f32[8,8], index: 5, kind: output, shape index: {}]  }
   0x1   :  { %v22_v0 = vld [vmem:[%s445_s1] sm:$0xff]  ;;  %v23_v1 = vld [vmem:[%s445_s1 + $0x8] sm:$0xff]  ;;  %280 = vmatprep.subr.bf16.mxu0 %v335_v2  ;;  %242 = vmatprep.mubr.msk.f32.mxu0 %vm336_vm0, %v337_v4  ;;  %v108_v7 = vld [vmem:[%s447_s3 + $0x10] sm:$0xff] }
   0x2   :  { %v281_v3 = vpack.c.bf16 %v23_v1, %v22_v0  ;;  %v106_v5 = vld [vmem:[%s447_s3] sm:$0xff]  ;;  %v107_v6 = vld [vmem:[%s447_s3 + $0x8] sm:$0xff]  ;;  %283 = vmatprep.subr.bf16.mxu1 %v335_v2  ;;  %v109_v9 = vld [vmem:[%s447_s3 + $0x18] sm:$0xff]  ;;  %277 = vmatprep.mubr.msk.f32.mxu1 %vm336_vm0, %v337_v4 }
   0x3   :  { %v284_v8 = vpack.c.bf16 %v107_v6, %v106_v5  ;;  %v21_v10 = vld [vmem:[%s444_s0] sm:$0xff]  ;;  %v287_v11 = vpack.c.bf16 %v109_v9, %v108_v7  ;;  %v111_v13 = vld [vmem:[%s447_s3 + $0x28] sm:$0xff] }
   0x4   :  { %282 = vmatpush3.bf16.msra.mxu0 %v281_v3  ;;  %v110_v12 = vld [vmem:[%s447_s3 + $0x20] sm:$0xff] }
   0x5   :  { %285 = vmatpush3.bf16.msra.mxu1 %v284_v8 }
   0x6   :  { %286 = vmatprep.subr.bf16.mxu1 %v335_v2 }
   0x7   :  { %243 = vmatmul.mubr.msk.f32.vlgmr.msra.gmra.mrb[0].mxu0 %vm31_vm1, %v21_v10 }
   0x8   :  { %10 = vsyncpa [#allocation3], 0  ;;  %v290_v14 = vpack.c.bf16 %v111_v13, %v110_v12  ;;  %v112_v15 = vld [vmem:[%s447_s3 + $0x30] sm:$0xff]  ;;  %v113_v16 = vld [vmem:[%s447_s3 + $0x38] sm:$0xff]  ;;  %s338_s7 = smov [#allocation2]   ;;  %vm199_vm2 = vcmask 64512  }
   0x9   :  { %288 = vmatpush3.bf16.msra.mxu1 %v287_v11  ;;  %v293_v17 = vpack.c.bf16 %v113_v16, %v112_v15  ;;  %v114_v18 = vld [vmem:[%s447_s3 + $0x40] sm:$0xff]  ;;  %v115_v19 = vld [vmem:[%s447_s3 + $0x48] sm:$0xff]  ;;  %v116_v21 = vld [vmem:[%s447_s3 + $0x50] sm:$0xff]  ;;  %s207_s8 = sshll.u32 %s338_s7, 4  ;;  %s208_s8 = int_to_ptr.vmem [resolvable:$true] %s207_s8 }
   0xa   :  { %289 = vmatprep.subr.bf16.mxu1 %v335_v2  ;;  %v296_v20 = vpack.c.bf16 %v115_v19, %v114_v18  ;;  %v117_v22 = vld [vmem:[%s447_s3 + $0x58] sm:$0xff]  ;;  %v118_v24 = vld [vmem:[%s447_s3 + $0x60] sm:$0xff]  ;;  %v119_v25 = vld [vmem:[%s447_s3 + $0x68] sm:$0xff]  ;;  %p316_p1 = scmp.lt.s32.totalorder %s208_s8, %s208_s8 }
   0xb   :  { %v299_v23 = vpack.c.bf16 %v117_v22, %v116_v21  ;;  %v302_v26 = vpack.c.bf16 %v119_v25, %v118_v24  ;;  %v120_v27 = vld [vmem:[%s447_s3 + $0x70] sm:$0xff]  ;;  %v121_v28 = vld [vmem:[%s447_s3 + $0x78] sm:$0xff]  ;;  %v215_v30 = vld [vmem:[%s446_s2] ss:$0 sm:$0xff]  ;;  %s311_s3 = scalar_lea.vmem %s208_s8, 128 }
   0xc   :  { %v305_v29 = vpack.c.bf16 %v121_v28, %v120_v27  ;;  %v217_v35 = vld [vmem:[%s448_s4] ss:$0 sm:$0xff]  ;;  %p312_p0 = scmp.ne.s32.totalorder %s208_s8, %s311_s3  ;;  %p317_p2 = scmp.lt.s32.totalorder %s311_s3, %s311_s3 }
   0xd   :  { %291 = vmatpush3.bf16.msra.mxu1 %v290_v14 }
   0xe   :  { %292 = vmatprep.subr.bf16.mxu1 %v335_v2  ;;  %p318_p3 = por %p317_p2, %p316_p1 }
  0x10   :  { %p319_p4 = pnand %p318_p3, %p312_p0 }
  0x11   :  { %294 = vmatpush3.bf16.msra.mxu1 %v293_v17 }
  0x12   :  { %295 = vmatprep.subr.bf16.mxu1 %v335_v2 }
  0x15   :  { %297 = vmatpush3.bf16.msra.mxu1 %v296_v20 }
  0x16   :  { %298 = vmatprep.subr.bf16.mxu1 %v335_v2 }
  0x19   :  { %300 = vmatpush3.bf16.msra.mxu1 %v299_v23 }
  0x1a   :  { %301 = vmatprep.subr.bf16.mxu1 %v335_v2 }
  0x1d   :  { %303 = vmatpush3.bf16.msra.mxu1 %v302_v26 }
  0x1e   :  { %304 = vmatprep.subr.bf16.mxu1 %v335_v2 }
  0x21   :  { %306 = vmatpush3.bf16.msra.mxu1 %v305_v29 }
  0xda   :  { %v101_v31 = vpop.f32.mrb[0].mxu0 }
  0xdb   :  { %v102_v32 = vadd.f32 %v215_v30, %v101_v31  ;;  %v244_v33 = vpop.f32.mrb[1].mxu0 }
  0xdd   :  { %v105_v34 = vmax.f32 %v102_v32, 0.0 }
  0xdf   :  { %278 = vmatmul.mubr.f32.vlgmr.msra.gmra.mrb[0].mxu1 %v105_v34 }
 0x1b2   :  { %v195_v36 = vpop.f32.mrb[0].mxu1 }
 0x1b3   :  { %v196_v37 = vadd.f32 %v217_v35, %v195_v36  ;;  %v279_v38 = vpop.f32.mrb[1].mxu1 }
 0x1b5   :  { %200 = vst.msk [vmem:[#allocation2] sm:$0xff] %vm199_vm2, %v196_v37 }
 0x1b6   :  { %322 = shalt.err (!%p319_p4)
}
 0x1b7   :  { %s323_s10 = scalar_lea.hbm %s449_s5, 128 }
 0x1b8   :  { %p324_p5 = scmp.ne.s32.totalorder %s449_s5, %s323_s10  ;;  %p327_p6 = scmp.lt.u32.totalorder %s323_s10, %s449_s5 }
 0x1ba   :  { %p329_p7 = pnand %p327_p6, %p324_p5 }
 0x1bc   :  { %332 = shalt.err (!%p329_p7)
}
 0x1bd   :  { %210 = dma.vmem_to_hbm [thread:$0]  %s208_s8, 128, %s449_s5, [#allocation3]  }
 0x1be   :  { %333 = dma.done.wait [#allocation3], 128  }
 0x1bf   :  { %334 = vsyncadd [#allocation3], 4294967168 }
 0x1c0   :  { %214 = vsyncpa [#allocation3], 1 }

</bundles_post_ra>
